<compile_context>
chip_gen: v7x
topology: tpu7x:2x2x1
jax: 0.10.0
libtpu: 0.0.40
codegen_flags: <defaults>
</compile_context>

<pallas_src>
import jax
import jax.numpy as jnp
from jax import lax
from jax.experimental import pallas as pl
from jax.experimental.pallas import tpu as pltpu

EPS = 1e-5


def _pin_kernel(x_ref, style_ref, o_ref):
    # x_ref:     (rows_tile, HW)   one row per (n, c) instance
    # style_ref: (rows_tile, 2)    col 0 = style mean, col 1 = style std
    x = x_ref[...].astype(jnp.float32)
    hw = x.shape[-1]

    # One elementwise sweep (x*x) + two lane reductions.
    s1 = jnp.sum(x, axis=-1, keepdims=True)
    s2 = jnp.sum(x * x, axis=-1, keepdims=True)

    mean = s1 * jnp.float32(1.0 / hw)
    # Unbiased variance (torch.var default): (sum(x^2) - hw*mean^2) / (hw - 1)
    var = (s2 - s1 * mean) * jnp.float32(1.0 / (hw - 1))
    var = jnp.maximum(var, 0.0)  # guard tiny negative from f32 cancellation
    inv_std = lax.rsqrt(var + jnp.float32(EPS))

    style = style_ref[...].astype(jnp.float32)
    s_mean = style[:, 0:1]
    s_std = jnp.maximum(style[:, 1:2], 0.0)  # style_std.data.clamp_(min=0)

    # out = relu((x - mean) * inv_std * s_std + s_mean) fused into one FMA pass
    scale = inv_std * s_std
    bias = s_mean - mean * scale
    out = x * scale + bias
    o_ref[...] = jnp.maximum(out, 0.0).astype(o_ref.dtype)


def _pick_rows_per_tile(nc, hw, itemsize, sublane, block_budget_bytes=4 << 20):
    """Largest row-tile that divides nc, is sublane-aligned, and fits budget."""
    row_bytes = max(1, hw * itemsize)
    cap = max(1, block_budget_bytes // row_bytes)
    if nc <= cap:
        return nc  # whole array in one block (block dim == full dim is legal)
    best_any = 1
    best_aligned = None
    d = 1
    while d * d <= nc:
        if nc % d == 0:
            for cand in (d, nc // d):
                if cand <= cap:
                    best_any = max(best_any, cand)
                    if cand % sublane == 0:
                        best_aligned = max(best_aligned or 0, cand)
        d += 1
    return best_aligned if best_aligned is not None else best_any


def pin_forward(content_feat, style_mean, style_std):
    """content_feat: (N, C, H, W); style_mean/style_std: (N, C, 1, 1)."""
    N, C, H, W = content_feat.shape
    NC, HW = N * C, H * W
    assert HW > 1, "unbiased variance needs at least 2 spatial elements"

    x2d = content_feat.reshape(NC, HW)
    # Pack the two per-instance style parameters into one (NC, 2) slab.
    style2d = jnp.concatenate(
        [style_mean.reshape(NC, 1), style_std.reshape(NC, 1)], axis=-1
    )

    itemsize = jnp.dtype(content_feat.dtype).itemsize
    # Sublane packing: 8 rows per vreg for 32-bit, 16 for bf16, 32 for int8.
    sublane = max(8, 32 // itemsize)
    rows_per_tile = _pick_rows_per_tile(NC, HW, itemsize, sublane)
    assert NC % rows_per_tile == 0
    grid = (NC // rows_per_tile,)

    # VMEM working set: double-buffered in + out blocks, f32 compute temps,
    # tiny style blocks, plus headroom. Clamp to stay under v7x's 64 MiB
    # physical VMEM while still allowing bigger-than-default scoped limits.
    block_bytes = rows_per_tile * HW * itemsize
    f32_tmp_bytes = rows_per_tile * HW * 4
    out_bytes = rows_per_tile * HW * itemsize
    vmem_limit = 2 * block_bytes + 2 * out_bytes + 2 * f32_tmp_bytes + (4 << 20)
    vmem_limit = int(min(max(vmem_limit, 16 << 20), 48 << 20))

    out2d = pl.pallas_call(
        _pin_kernel,
        out_shape=jax.ShapeDtypeStruct((NC, HW), content_feat.dtype),
        grid_spec=pltpu.PrefetchScalarGridSpec(
            num_scalar_prefetch=0,
            grid=grid,
            in_specs=[
                pl.BlockSpec((rows_per_tile, HW), lambda i: (i, 0)),
                pl.BlockSpec((rows_per_tile, 2), lambda i: (i, 0)),
            ],
            out_specs=pl.BlockSpec((rows_per_tile, HW), lambda i: (i, 0)),
        ),
        compiler_params=pltpu.CompilerParams(
            dimension_semantics=("parallel",),
            vmem_limit_bytes=vmem_limit,
        ),
    )(x2d, style2d)

    return out2d.reshape(N, C, H, W)


def calc_mean_std_ref(feat, eps=EPS):
    # pure-JAX reference for the torch calc_mean_std (unbiased var)
    N, C = feat.shape[:2]
    flat = feat.reshape(N, C, -1)
    mean = jnp.mean(flat, axis=2).reshape(N, C, 1, 1)
    var = jnp.var(flat, axis=2, ddof=1) + eps
    std = jnp.sqrt(var).reshape(N, C, 1, 1)
    return mean, std


if __name__ == "__main__":
    key = jax.random.PRNGKey(0)
    N, C, H, W = 2, 4, 16, 16
    content_feat = jax.random.normal(key, (N, C, H, W), dtype=jnp.float32)

    # Deterministic parameter init, matching PIN.__init__:
    # style_mean / style_std start as the content feature's mean / std.
    style_mean, style_std = calc_mean_std_ref(content_feat)

    out = pin_forward(content_feat, style_mean, style_std)
    out = jax.block_until_ready(out)

    # sanity check against a pure-JAX reference of the forward pass
    c_mean, c_std = calc_mean_std_ref(content_feat)
    norm = (content_feat - c_mean) / c_std
    ref = jnp.maximum(norm * jnp.maximum(style_std, 0.0) + style_mean, 0.0)
    assert jnp.allclose(out, ref, atol=1e-4, rtol=1e-4), "mismatch vs reference"

    print("KERNEL_OK")
</pallas_src>

<mosaic_0001>
module attributes {stable_mosaic.version = 11 : i64} {
  func.func @_pin_kernel(%arg0: i32, %arg1: memref<8x256xf32, #tpu.memory_space<vmem>>, %arg2: memref<8x2xf32, #tpu.memory_space<vmem>>, %arg3: memref<8x256xf32, #tpu.memory_space<vmem>>) attributes {dimension_semantics = [#tpu.dimension_semantics<parallel>], iteration_bounds = array<i64: 1>, scalar_prefetch = 0 : i64, scratch_operands = 0 : i64, tpu.core_type = #tpu.core_type<tc>, window_params = [{transform_indices = @transform_0, window_bounds = array<i64: 8, 256>}, {transform_indices = @transform_1, window_bounds = array<i64: 8, 2>}, {transform_indices = @transform_2, window_bounds = array<i64: 8, 256>}]} {
    %c0 = arith.constant 0 : index
    %c0_0 = arith.constant 0 : index
    %0 = vector.load %arg1[%c0, %c0_0] : memref<8x256xf32, #tpu.memory_space<vmem>>, vector<8x256xf32>
    %cst = arith.constant dense<0.000000e+00> : vector<8xf32>
    %1 = vector.multi_reduction <add>, %0, %cst [1] : vector<8x256xf32> to vector<8xf32>
    %2 = vector.shape_cast %1 : vector<8xf32> to vector<8x1xf32>
    %3 = arith.mulf %0, %0 : vector<8x256xf32>
    %cst_1 = arith.constant dense<0.000000e+00> : vector<8xf32>
    %4 = vector.multi_reduction <add>, %3, %cst_1 [1] : vector<8x256xf32> to vector<8xf32>
    %5 = vector.shape_cast %4 : vector<8xf32> to vector<8x1xf32>
    %cst_2 = arith.constant 3.906250e-03 : f32
    %6 = vector.broadcast %cst_2 : f32 to vector<8x1xf32>
    %7 = arith.mulf %2, %6 : vector<8x1xf32>
    %8 = arith.mulf %2, %7 : vector<8x1xf32>
    %9 = arith.subf %5, %8 : vector<8x1xf32>
    %cst_3 = arith.constant 0.00392156886 : f32
    %10 = vector.broadcast %cst_3 : f32 to vector<8x1xf32>
    %11 = arith.mulf %9, %10 : vector<8x1xf32>
    %cst_4 = arith.constant 0.000000e+00 : f32
    %12 = vector.broadcast %cst_4 : f32 to vector<8x1xf32>
    %13 = arith.maximumf %11, %12 : vector<8x1xf32>
    %cst_5 = arith.constant 9.99999974E-6 : f32
    %14 = vector.broadcast %cst_5 : f32 to vector<8x1xf32>
    %15 = arith.addf %13, %14 : vector<8x1xf32>
    %16 = math.rsqrt %15 : vector<8x1xf32>
    %c0_6 = arith.constant 0 : index
    %c0_7 = arith.constant 0 : index
    %17 = vector.load %arg2[%c0_6, %c0_7] : memref<8x2xf32, #tpu.memory_space<vmem>>, vector<8x2xf32>
    %18 = vector.extract_strided_slice %17 {offsets = [0, 0], sizes = [8, 1], strides = [1, 1]} : vector<8x2xf32> to vector<8x1xf32>
    %19 = vector.extract_strided_slice %17 {offsets = [0, 1], sizes = [8, 1], strides = [1, 1]} : vector<8x2xf32> to vector<8x1xf32>
    %cst_8 = arith.constant 0.000000e+00 : f32
    %20 = vector.broadcast %cst_8 : f32 to vector<8x1xf32>
    %21 = arith.maximumf %19, %20 : vector<8x1xf32>
    %22 = arith.mulf %16, %21 : vector<8x1xf32>
    %23 = arith.mulf %7, %22 : vector<8x1xf32>
    %24 = arith.subf %18, %23 : vector<8x1xf32>
    %25 = vector.broadcast %22 : vector<8x1xf32> to vector<8x256xf32>
    %26 = arith.mulf %0, %25 : vector<8x256xf32>
    %27 = vector.broadcast %24 : vector<8x1xf32> to vector<8x256xf32>
    %28 = arith.addf %26, %27 : vector<8x256xf32>
    %cst_9 = arith.constant 0.000000e+00 : f32
    %29 = vector.broadcast %cst_9 : f32 to vector<8x256xf32>
    %30 = arith.maximumf %28, %29 : vector<8x256xf32>
    %c0_10 = arith.constant 0 : index
    %c0_11 = arith.constant 0 : index
    %31 = vector.load %arg3[%c0_10, %c0_11] : memref<8x256xf32, #tpu.memory_space<vmem>>, vector<8x256xf32>
    tpu.vector_store %arg3[%c0_10, %c0_11], %30 {strides = array<i32>} : memref<8x256xf32, #tpu.memory_space<vmem>>, vector<8x256xf32>,
    return
  }
  func.func @transform_0(%arg0: i32) -> (i32, i32) {
    %c0_i32 = arith.constant 0 : i32
    %c0_i32_0 = arith.constant 0 : i32
    return %arg0, %c0_i32 : i32, i32
  }
  func.func @transform_1(%arg0: i32) -> (i32, i32) {
    %c0_i32 = arith.constant 0 : i32
    %c0_i32_0 = arith.constant 0 : i32
    return %arg0, %c0_i32 : i32, i32
  }
  func.func @transform_2(%arg0: i32) -> (i32, i32) {
    %c0_i32 = arith.constant 0 : i32
    %c0_i32_0 = arith.constant 0 : i32
    return %arg0, %c0_i32 : i32, i32
  }
}

</mosaic_0001>

<bundles_post_ra>
// kernel: tpu_custom_call.1
= control target key start
LH: loop header
LB: loop body
LE: loop exit
PB: predicated region body
PF: predicated region fallthrough
CT: control target
= control target key end

     0   :  { %7 = vsyncpa [#allocation3], 0  ;;  %s187_s0 = inlined_call_operand.hbm [shape: f32[8,256], index: 0, kind: input, shape index: {}]   ;;  %s188_s1 = inlined_call_operand.vmem [shape: f32[8,2], index: 1, kind: input, shape index: {}]   ;;  %s189_s2 = inlined_call_operand.hbm [shape: f32[8,256], index: 2, kind: output, shape index: {}]  }
   0x1   :  { %8 = vsyncpa [#allocation4], 0  ;;  %s140_s9 = smov [#allocation2]   ;;  %s92_s13 = scalar_lea.hbm %s187_s0, 256 }
   0x2   :  { %s15_s10 = sshll.u32 %s140_s9, 4  ;;  %p93_p0 = scmp.ne.s32.totalorder %s187_s0, %s92_s13  ;;  %s16_s10 = int_to_ptr.vmem [resolvable:$true] %s15_s10 }
   0x3   :  { %p96_p1 = scmp.lt.u32.totalorder %s92_s13, %s187_s0 }
   0x5   :  { %p98_p2 = pnand %p96_p1, %p93_p0 }
   0x7   :  { %101 = shalt.err (!%p98_p2)
}
   0x8   :  { %s102_s18 = scalar_lea.vmem %s16_s10, 256  ;;  %p107_p4 = scmp.lt.s32.totalorder %s16_s10, %s16_s10 }
   0x9   :  { %p103_p3 = scmp.ne.s32.totalorder %s16_s10, %s102_s18  ;;  %p108_p5 = scmp.lt.s32.totalorder %s102_s18, %s102_s18 }
   0xb   :  { %p109_p6 = por %p108_p5, %p107_p4 }
   0xd   :  { %p110_p7 = pnand %p109_p6, %p103_p3 }
   0xf   :  { %113 = shalt.err (!%p110_p7)
}
  0x10   :  { %18 = dma.hbm_to_vmem [thread:$0]  %s187_s0, 256, %s16_s10, [#allocation3]  }
  0x11   :  { %136 = dma.done.wait [#allocation3], 256  }
  0x12   :  { %137 = vsyncadd [#allocation3], 4294967040  ;;  %v24_v0 = vld [vmem:[#allocation2] sm:$0xff]  ;;  %v25_v1 = vld [vmem:[#allocation2 + $0x8] sm:$0xff]  ;;  %v141_v6 = vmov 1   ;;  %v142_v15 = vmov 0  }
  0x13   :  { %v26_v2 = vadd.f32 %v25_v1, %v24_v0  ;;  %v29_v3 = vmul.f32 %v24_v0, %v24_v0  ;;  %v30_v4 = vmul.f32 %v25_v1, %v25_v1  ;;  %88 = vset.pattern.permute.xlu1 %v141_v6  ;;  %89 = vset.pattern.permute.xlu0 %v142_v15  ;;  %v41_v16 = vld [vmem:[%s188_s1] sm:$0xff]  ;;  %s143_s22 = smov 127   ;;  %s144_s23 = smov [#allocation5]  }
  0x14   :  { %v42_v17 = vmax.f32 %v41_v16, 0.0  ;;  %s74_s24 = sshll.u32 %s144_s23, 4  ;;  %s75_s24 = int_to_ptr.vmem [resolvable:$true] %s74_s24 }
  0x15   :  { %27 = vadd.xlane.f32.xlu0 %v26_v2  ;;  %v31_v5 = vadd.f32 %v30_v4, %v29_v3  ;;  %s114_s1 = scalar_lea.vmem %s75_s24, 256  ;;  %p119_p9 = scmp.lt.s32.totalorder %s75_s24, %s75_s24 }
  0x16   :  { %p115_p8 = scmp.ne.s32.totalorder %s75_s24, %s114_s1  ;;  %p120_p10 = scmp.lt.s32.totalorder %s114_s1, %s114_s1 }
  0x18   :  { %p121_p11 = por %p120_p10, %p119_p9 }
  0x19   :  { %32 = vadd.xlane.f32.xlu0 %v31_v5 }
  0x1a   :  { %p122_p12 = pnand %p121_p11, %p115_p8 }
  0xa2   :  { %v28_v7 = vpop.xlane.xlu0 %27 }
  0xa3   :  { %v34_v8 = vmul.f32 0.00390625, %v28_v7 }
  0xa5   :  { %v35_v9 = vmul.f32 %v34_v8, %v28_v7 }
  0xa6   :  { %v33_v10 = vpop.xlane.xlu0 %32 }
  0xa7   :  { %v36_v11 = vsub.f32 %v33_v10, %v35_v9 }
  0xa9   :  { %v37_v12 = vmul.f32 0.003921569, %v36_v11 }
  0xab   :  { %v38_v13 = vmax.f32 %v37_v12, 0.0 }
  0xad   :  { %v39_v14 = vadd.f32 1e-05, %v38_v13 }
  0xaf   :  { %90 = vrsqrt.f32 %v39_v14 }
  0xb9   :  { %v91_v18 = vpop.eup %90 }
  0xba   :  { %v43_v19 = vmul.f32 %v91_v18, %v42_v17 }
  0xbc   :  { %v44_v20 = vmul.f32 %v43_v19, %v34_v8 }
  0xbe   :  { %46 = vrot.lane.b32.xlu1 %v44_v20, %s143_s22 }
  0xc2   :  { %52 = vperm.xlu1 %88, %v43_v19  }
 0x130   :  { %v47_v21 = vpop.permute.xlu1 %46 }
 0x131   :  { %v49_v22 = vsub.f32 %v41_v16, %v47_v21 }
 0x133   :  { %59 = vperm.xlu0 %89, %v49_v22  }
 0x141   :  { %v53_v23 = vpop.permute.xlu1 %52 }
 0x142   :  { %v55_v24 = vmul.f32 %v53_v23, %v24_v0  ;;  %v56_v25 = vmul.f32 %v53_v23, %v25_v1 }
 0x1b2   :  { %v60_v26 = vpop.permute.xlu0 %59 }
 0x1b3   :  { %v62_v27 = vadd.f32 %v60_v26, %v55_v24  ;;  %v63_v28 = vadd.f32 %v60_v26, %v56_v25 }
 0x1b5   :  { %v64_v29 = vmax.f32 %v62_v27, 0.0  ;;  %v65_v30 = vmax.f32 %v63_v28, 0.0 }
 0x1b7   :  { %66 = vst [vmem:[#allocation5] sm:$0xff] %v64_v29  ;;  %67 = vst [vmem:[#allocation5 + $0x8] sm:$0xff] %v65_v30 }
 0x1b8   :  { %125 = shalt.err (!%p122_p12)
}
 0x1b9   :  { %s126_s27 = scalar_lea.hbm %s189_s2, 256 }
 0x1ba   :  { %p127_p13 = scmp.ne.s32.totalorder %s189_s2, %s126_s27  ;;  %p130_p0 = scmp.lt.u32.totalorder %s126_s27, %s189_s2 }
 0x1bc   :  { %p132_p1 = pnand %p130_p0, %p127_p13 }
 0x1be   :  { %135 = shalt.err (!%p132_p1)
}
 0x1bf   :  { %77 = dma.vmem_to_hbm [thread:$0]  %s75_s24, 256, %s189_s2, [#allocation4]  }
 0x1c0   :  { %138 = dma.done.wait [#allocation4], 256  }
 0x1c1   :  { %139 = vsyncadd [#allocation4], 4294967040 }
 0x1c2   :  { %81 = vsyncpa [#allocation3], 1 }
 0x1c3   :  { %82 = vsyncpa [#allocation4], 1 }

</bundles_post_ra>
